<compile_context>
chip_gen: v7x
topology: tpu7x:2x2x1
jax: 0.10.0
libtpu: 0.0.40
codegen_flags: <defaults>
</compile_context>

<pallas_src>
import functools

import jax
import jax.numpy as jnp
from jax import lax
from jax.experimental import pallas as pl
from jax.experimental.pallas import tpu as pltpu

P_DROP = 0.5
KEEP_PROB = 1.0 - P_DROP
INV_KEEP = 1.0 / KEEP_PROB
# keep element iff hashed uint32 bits < KEEP_THRESHOLD
KEEP_THRESHOLD = min(int(KEEP_PROB * float(2 ** 32)), 2 ** 32 - 1)

IN_F = 5
HID_F = 3
OUT_F = 2

LANES = 128
SUBLANE_BLOCKS = 8                    # second-to-last block dim (multiple of 8)
TILE_ROWS = SUBLANE_BLOCKS * LANES    # 1024 batch rows per grid step


def _mix_bits(idx_u32, key_u32):
    """Murmur3-finalizer style hash -> pseudo-random uint32 bits (pure VPU int ops)."""
    h = idx_u32 ^ key_u32
    h = h * jnp.uint32(0x9E3779B1)
    h = h ^ (h >> 15)
    h = h * jnp.uint32(0x85EBCA6B)
    h = h ^ (h >> 13)
    h = h * jnp.uint32(0xC2B2AE35)
    h = h ^ (h >> 16)
    return h


def _dropout_model_kernel(seed_ref, x_ref, w1_ref, b1_ref, w2_ref, b2_ref, o_ref,
                          *, training: bool):
    plane_shape = (SUBLANE_BLOCKS, LANES)

    # x tile: (5, 8, 128) -- one dense (8,128) plane per input feature.
    x = [x_ref[k] for k in range(IN_F)]

    # fc1 + ReLU: broadcast FMAs on the VPU (a 5x3 contraction would leave the
    # MXU >99% idle); weights/biases are SMEM scalars.
    h = []
    for j in range(HID_F):
        acc = x[0] * w1_ref[0, j]
        for k in range(1, IN_F):
            acc = acc + x[k] * w1_ref[k, j]
        acc = acc + b1_ref[j]
        h.append(jnp.maximum(acc, 0.0))

    # Inverted dropout: Binomial(1, 1-p) mask scaled by 1/(1-p).
    if training:
        # Per-grid-step key so different batch tiles get independent masks.
        key = ((seed_ref[0] + pl.program_id(0) * 1000003)
               .astype(jnp.uint32) * jnp.uint32(0x27D4EB2F))
        row = lax.broadcasted_iota(jnp.int32, plane_shape, 0)
        col = lax.broadcasted_iota(jnp.int32, plane_shape, 1)
        local = (row * LANES + col).astype(jnp.uint32)
        thresh = jnp.uint32(KEEP_THRESHOLD)
        for j in range(HID_F):
            bits = _mix_bits(local + jnp.uint32(j * TILE_ROWS), key)
            h[j] = jnp.where(bits < thresh, h[j] * INV_KEEP, 0.0)

    # output layer (fc2): 3x2 contraction as VPU FMAs.
    logits = []
    for i in range(OUT_F):
        acc = h[0] * w2_ref[0, i]
        for j in range(1, HID_F):
            acc = acc + h[j] * w2_ref[j, i]
        logits.append(acc + b2_ref[i])

    # Softmax over the 2 classes, fully elementwise (no cross-lane reductions).
    m = jnp.maximum(logits[0], logits[1])
    e0 = jnp.exp(logits[0] - m)
    e1 = jnp.exp(logits[1] - m)
    inv = 1.0 / (e0 + e1)
    o_ref[0] = (e0 * inv).astype(o_ref.dtype)
    o_ref[1] = (e1 * inv).astype(o_ref.dtype)


def dropout_model_forward(x, w1, b1, w2, b2, *, seed=0, training=True):
    """x: (N, 5) float32.  Returns softmax probabilities of shape (N, 2)."""
    n = x.shape[0]
    n_pad = ((n + TILE_ROWS - 1) // TILE_ROWS) * TILE_ROWS
    if n_pad != n:
        x = jnp.pad(x, ((0, n_pad - n), (0, 0)))

    # Transpose so the batch fills the dense (sublane, lane) dims of every vreg.
    xt = x.T.reshape(IN_F, n_pad // LANES, LANES)
    n_tiles = n_pad // TILE_ROWS

    seed_arr = jnp.asarray([seed], dtype=jnp.int32)
    w1 = jnp.asarray(w1, jnp.float32).reshape(IN_F, HID_F)
    b1 = jnp.asarray(b1, jnp.float32).reshape(HID_F)
    w2 = jnp.asarray(w2, jnp.float32).reshape(HID_F, OUT_F)
    b2 = jnp.asarray(b2, jnp.float32).reshape(OUT_F)

    kernel = functools.partial(_dropout_model_kernel, training=training)
    out = pl.pallas_call(
        kernel,
        out_shape=jax.ShapeDtypeStruct((OUT_F, n_pad // LANES, LANES), jnp.float32),
        grid=(n_tiles,),
        in_specs=[
            pl.BlockSpec(memory_space=pltpu.SMEM),                                # seed
            pl.BlockSpec((IN_F, SUBLANE_BLOCKS, LANES), lambda i: (0, i, 0)),     # x tile
            pl.BlockSpec(memory_space=pltpu.SMEM),                                # w1 (5,3)
            pl.BlockSpec(memory_space=pltpu.SMEM),                                # b1 (3,)
            pl.BlockSpec(memory_space=pltpu.SMEM),                                # w2 (3,2)
            pl.BlockSpec(memory_space=pltpu.SMEM),                                # b2 (2,)
        ],
        out_specs=pl.BlockSpec((OUT_F, SUBLANE_BLOCKS, LANES), lambda i: (0, i, 0)),
        compiler_params=pltpu.CompilerParams(
            dimension_semantics=("parallel",)),   # shards tiles across v7x's 2 TCs
        cost_estimate=pl.CostEstimate(
            flops=60 * n_pad, transcendentals=2 * n_pad, bytes_accessed=28 * n_pad),
    )(seed_arr, xt, w1, b1, w2, b2)

    return out.reshape(OUT_F, n_pad).T[:n]


def init_params(key):
    """Deterministic init mimicking nn.Linear (uniform(-1/sqrt(fan_in), +))."""
    k1, k2, k3, k4 = jax.random.split(key, 4)
    bound1 = 1.0 / jnp.sqrt(5.0)
    bound2 = 1.0 / jnp.sqrt(3.0)
    # stored as (in_features, out_features) so the kernel computes x @ W
    w1 = jax.random.uniform(k1, (IN_F, HID_F), jnp.float32, -bound1, bound1)
    b1 = jax.random.uniform(k2, (HID_F,), jnp.float32, -bound1, bound1)
    w2 = jax.random.uniform(k3, (HID_F, OUT_F), jnp.float32, -bound2, bound2)
    b2 = jax.random.uniform(k4, (OUT_F,), jnp.float32, -bound2, bound2)
    return w1, b1, w2, b2


def _reference_eval(x, w1, b1, w2, b2):
    h = jnp.maximum(x @ w1 + b1.reshape(1, -1), 0.0)
    logits = h @ w2 + b2.reshape(1, -1)
    return jax.nn.softmax(logits, axis=1)


if __name__ == "__main__":
    key = jax.random.PRNGKey(0)
    key_x, key_p = jax.random.split(key)

    batch = 8
    x = jax.random.normal(key_x, (batch, IN_F), dtype=jnp.float32)
    w1, b1, w2, b2 = init_params(key_p)

    # training=True path (fresh nn.Module default) with a fixed dropout seed.
    out_train = dropout_model_forward(x, w1, b1, w2, b2, seed=0, training=True)
    out_train = jax.block_until_ready(out_train)

    # eval path (dropout is identity); check against a pure-JAX reference.
    out_eval = dropout_model_forward(x, w1, b1, w2, b2, training=False)
    out_eval = jax.block_until_ready(out_eval)
    ref_eval = _reference_eval(x, w1, b1, w2, b2)

    assert out_train.shape == (batch, OUT_F) and out_eval.shape == (batch, OUT_F)
    assert jnp.allclose(out_eval, ref_eval, atol=1e-5, rtol=1e-5)
    assert jnp.allclose(jnp.sum(out_eval, axis=1), 1.0, atol=1e-5)
    assert jnp.allclose(jnp.sum(out_train, axis=1), 1.0, atol=1e-5)

    print("KERNEL_OK")
</pallas_src>

<mosaic_0001>
module attributes {stable_mosaic.version = 11 : i64} {
  func.func @_dropout_model_kernel(%arg0: i32, %arg1: memref<1xi32, #tpu.memory_space<smem>>, %arg2: memref<5x8x128xf32, #tpu.memory_space<vmem>>, %arg3: memref<5x3xf32, #tpu.memory_space<smem>>, %arg4: memref<3xf32, #tpu.memory_space<smem>>, %arg5: memref<3x2xf32, #tpu.memory_space<smem>>, %arg6: memref<2xf32, #tpu.memory_space<smem>>, %arg7: memref<2x8x128xf32, #tpu.memory_space<vmem>>) attributes {dimension_semantics = [#tpu.dimension_semantics<parallel>], iteration_bounds = array<i64: 1>, scalar_prefetch = 0 : i64, scratch_operands = 0 : i64, tpu.core_type = #tpu.core_type<tc>, window_params = [{transform_indices = @transform_0, window_bounds = array<i64: 1>}, {transform_indices = @transform_1, window_bounds = array<i64: 5, 8, 128>}, {transform_indices = @transform_2, window_bounds = array<i64: 5, 3>}, {transform_indices = @transform_3, window_bounds = array<i64: 3>}, {transform_indices = @transform_4, window_bounds = array<i64: 3, 2>}, {transform_indices = @transform_5, window_bounds = array<i64: 2>}, {transform_indices = @transform_6, window_bounds = array<i64: 2, 8, 128>}]} {
    %c0 = arith.constant 0 : index
    %c0_0 = arith.constant 0 : index
    %c0_1 = arith.constant 0 : index
    %0 = vector.load %arg2[%c0, %c0_0, %c0_1] : memref<5x8x128xf32, #tpu.memory_space<vmem>>, vector<1x8x128xf32>
    %1 = vector.shape_cast %0 : vector<1x8x128xf32> to vector<8x128xf32>
    %c1 = arith.constant 1 : index
    %c0_2 = arith.constant 0 : index
    %c0_3 = arith.constant 0 : index
    %2 = vector.load %arg2[%c1, %c0_2, %c0_3] : memref<5x8x128xf32, #tpu.memory_space<vmem>>, vector<1x8x128xf32>
    %3 = vector.shape_cast %2 : vector<1x8x128xf32> to vector<8x128xf32>
    %c2 = arith.constant 2 : index
    %c0_4 = arith.constant 0 : index
    %c0_5 = arith.constant 0 : index
    %4 = vector.load %arg2[%c2, %c0_4, %c0_5] : memref<5x8x128xf32, #tpu.memory_space<vmem>>, vector<1x8x128xf32>
    %5 = vector.shape_cast %4 : vector<1x8x128xf32> to vector<8x128xf32>
    %c3 = arith.constant 3 : index
    %c0_6 = arith.constant 0 : index
    %c0_7 = arith.constant 0 : index
    %6 = vector.load %arg2[%c3, %c0_6, %c0_7] : memref<5x8x128xf32, #tpu.memory_space<vmem>>, vector<1x8x128xf32>
    %7 = vector.shape_cast %6 : vector<1x8x128xf32> to vector<8x128xf32>
    %c4 = arith.constant 4 : index
    %c0_8 = arith.constant 0 : index
    %c0_9 = arith.constant 0 : index
    %8 = vector.load %arg2[%c4, %c0_8, %c0_9] : memref<5x8x128xf32, #tpu.memory_space<vmem>>, vector<1x8x128xf32>
    %9 = vector.shape_cast %8 : vector<1x8x128xf32> to vector<8x128xf32>
    %c0_10 = arith.constant 0 : index
    %c0_11 = arith.constant 0 : index
    %10 = memref.load %arg3[%c0_10, %c0_11] : memref<5x3xf32, #tpu.memory_space<smem>>
    %11 = vector.broadcast %10 : f32 to vector<8x128xf32>
    %12 = arith.mulf %1, %11 : vector<8x128xf32>
    %c1_12 = arith.constant 1 : index
    %c0_13 = arith.constant 0 : index
    %13 = memref.load %arg3[%c1_12, %c0_13] : memref<5x3xf32, #tpu.memory_space<smem>>
    %14 = vector.broadcast %13 : f32 to vector<8x128xf32>
    %15 = arith.mulf %3, %14 : vector<8x128xf32>
    %16 = arith.addf %12, %15 : vector<8x128xf32>
    %c2_14 = arith.constant 2 : index
    %c0_15 = arith.constant 0 : index
    %17 = memref.load %arg3[%c2_14, %c0_15] : memref<5x3xf32, #tpu.memory_space<smem>>
    %18 = vector.broadcast %17 : f32 to vector<8x128xf32>
    %19 = arith.mulf %5, %18 : vector<8x128xf32>
    %20 = arith.addf %16, %19 : vector<8x128xf32>
    %c3_16 = arith.constant 3 : index
    %c0_17 = arith.constant 0 : index
    %21 = memref.load %arg3[%c3_16, %c0_17] : memref<5x3xf32, #tpu.memory_space<smem>>
    %22 = vector.broadcast %21 : f32 to vector<8x128xf32>
    %23 = arith.mulf %7, %22 : vector<8x128xf32>
    %24 = arith.addf %20, %23 : vector<8x128xf32>
    %c4_18 = arith.constant 4 : index
    %c0_19 = arith.constant 0 : index
    %25 = memref.load %arg3[%c4_18, %c0_19] : memref<5x3xf32, #tpu.memory_space<smem>>
    %26 = vector.broadcast %25 : f32 to vector<8x128xf32>
    %27 = arith.mulf %9, %26 : vector<8x128xf32>
    %28 = arith.addf %24, %27 : vector<8x128xf32>
    %c0_20 = arith.constant 0 : index
    %29 = memref.load %arg4[%c0_20] : memref<3xf32, #tpu.memory_space<smem>>
    %30 = vector.broadcast %29 : f32 to vector<8x128xf32>
    %31 = arith.addf %28, %30 : vector<8x128xf32>
    %cst = arith.constant 0.000000e+00 : f32
    %32 = vector.broadcast %cst : f32 to vector<8x128xf32>
    %33 = arith.maximumf %31, %32 : vector<8x128xf32>
    %c0_21 = arith.constant 0 : index
    %c1_22 = arith.constant 1 : index
    %34 = memref.load %arg3[%c0_21, %c1_22] : memref<5x3xf32, #tpu.memory_space<smem>>
    %35 = vector.broadcast %34 : f32 to vector<8x128xf32>
    %36 = arith.mulf %1, %35 : vector<8x128xf32>
    %c1_23 = arith.constant 1 : index
    %c1_24 = arith.constant 1 : index
    %37 = memref.load %arg3[%c1_23, %c1_24] : memref<5x3xf32, #tpu.memory_space<smem>>
    %38 = vector.broadcast %37 : f32 to vector<8x128xf32>
    %39 = arith.mulf %3, %38 : vector<8x128xf32>
    %40 = arith.addf %36, %39 : vector<8x128xf32>
    %c2_25 = arith.constant 2 : index
    %c1_26 = arith.constant 1 : index
    %41 = memref.load %arg3[%c2_25, %c1_26] : memref<5x3xf32, #tpu.memory_space<smem>>
    %42 = vector.broadcast %41 : f32 to vector<8x128xf32>
    %43 = arith.mulf %5, %42 : vector<8x128xf32>
    %44 = arith.addf %40, %43 : vector<8x128xf32>
    %c3_27 = arith.constant 3 : index
    %c1_28 = arith.constant 1 : index
    %45 = memref.load %arg3[%c3_27, %c1_28] : memref<5x3xf32, #tpu.memory_space<smem>>
    %46 = vector.broadcast %45 : f32 to vector<8x128xf32>
    %47 = arith.mulf %7, %46 : vector<8x128xf32>
    %48 = arith.addf %44, %47 : vector<8x128xf32>
    %c4_29 = arith.constant 4 : index
    %c1_30 = arith.constant 1 : index
    %49 = memref.load %arg3[%c4_29, %c1_30] : memref<5x3xf32, #tpu.memory_space<smem>>
    %50 = vector.broadcast %49 : f32 to vector<8x128xf32>
    %51 = arith.mulf %9, %50 : vector<8x128xf32>
    %52 = arith.addf %48, %51 : vector<8x128xf32>
    %c1_31 = arith.constant 1 : index
    %53 = memref.load %arg4[%c1_31] : memref<3xf32, #tpu.memory_space<smem>>
    %54 = vector.broadcast %53 : f32 to vector<8x128xf32>
    %55 = arith.addf %52, %54 : vector<8x128xf32>
    %cst_32 = arith.constant 0.000000e+00 : f32
    %56 = vector.broadcast %cst_32 : f32 to vector<8x128xf32>
    %57 = arith.maximumf %55, %56 : vector<8x128xf32>
    %c0_33 = arith.constant 0 : index
    %c2_34 = arith.constant 2 : index
    %58 = memref.load %arg3[%c0_33, %c2_34] : memref<5x3xf32, #tpu.memory_space<smem>>
    %59 = vector.broadcast %58 : f32 to vector<8x128xf32>
    %60 = arith.mulf %1, %59 : vector<8x128xf32>
    %c1_35 = arith.constant 1 : index
    %c2_36 = arith.constant 2 : index
    %61 = memref.load %arg3[%c1_35, %c2_36] : memref<5x3xf32, #tpu.memory_space<smem>>
    %62 = vector.broadcast %61 : f32 to vector<8x128xf32>
    %63 = arith.mulf %3, %62 : vector<8x128xf32>
    %64 = arith.addf %60, %63 : vector<8x128xf32>
    %c2_37 = arith.constant 2 : index
    %c2_38 = arith.constant 2 : index
    %65 = memref.load %arg3[%c2_37, %c2_38] : memref<5x3xf32, #tpu.memory_space<smem>>
    %66 = vector.broadcast %65 : f32 to vector<8x128xf32>
    %67 = arith.mulf %5, %66 : vector<8x128xf32>
    %68 = arith.addf %64, %67 : vector<8x128xf32>
    %c3_39 = arith.constant 3 : index
    %c2_40 = arith.constant 2 : index
    %69 = memref.load %arg3[%c3_39, %c2_40] : memref<5x3xf32, #tpu.memory_space<smem>>
    %70 = vector.broadcast %69 : f32 to vector<8x128xf32>
    %71 = arith.mulf %7, %70 : vector<8x128xf32>
    %72 = arith.addf %68, %71 : vector<8x128xf32>
    %c4_41 = arith.constant 4 : index
    %c2_42 = arith.constant 2 : index
    %73 = memref.load %arg3[%c4_41, %c2_42] : memref<5x3xf32, #tpu.memory_space<smem>>
    %74 = vector.broadcast %73 : f32 to vector<8x128xf32>
    %75 = arith.mulf %9, %74 : vector<8x128xf32>
    %76 = arith.addf %72, %75 : vector<8x128xf32>
    %c2_43 = arith.constant 2 : index
    %77 = memref.load %arg4[%c2_43] : memref<3xf32, #tpu.memory_space<smem>>
    %78 = vector.broadcast %77 : f32 to vector<8x128xf32>
    %79 = arith.addf %76, %78 : vector<8x128xf32>
    %cst_44 = arith.constant 0.000000e+00 : f32
    %80 = vector.broadcast %cst_44 : f32 to vector<8x128xf32>
    %81 = arith.maximumf %79, %80 : vector<8x128xf32>
    %c0_45 = arith.constant 0 : index
    %82 = memref.load %arg1[%c0_45] : memref<1xi32, #tpu.memory_space<smem>>
    %c1000003_i32 = arith.constant 1000003 : i32
    %83 = arith.muli %arg0, %c1000003_i32 : i32
    %84 = arith.addi %82, %83 : i32
    %c668265263_i32 = arith.constant 668265263 : i32
    %85 = arith.muli %84, %c668265263_i32 : i32
    %86 = tpu.iota {dimensions = array<i32: 0>} : vector<8x128xi32>
    %87 = tpu.iota {dimensions = array<i32: 1>} : vector<8x128xi32>
    %c128_i32 = arith.constant 128 : i32
    %88 = vector.broadcast %c128_i32 : i32 to vector<8x128xi32>
    %89 = arith.muli %86, %88 : vector<8x128xi32>
    %90 = arith.addi %89, %87 : vector<8x128xi32>
    %c0_i32 = arith.constant 0 : i32
    %91 = vector.broadcast %c0_i32 : i32 to vector<8x128xi32>
    %92 = arith.addi %90, %91 : vector<8x128xi32>
    %93 = vector.broadcast %85 : i32 to vector<8x128xi32>
    %94 = arith.xori %92, %93 : vector<8x128xi32>
    %c-1640531535_i32 = arith.constant -1640531535 : i32
    %95 = vector.broadcast %c-1640531535_i32 : i32 to vector<8x128xi32>
    %96 = arith.muli %94, %95 : vector<8x128xi32>
    %c15_i32 = arith.constant 15 : i32
    %97 = vector.broadcast %c15_i32 : i32 to vector<8x128xi32>
    %98 = arith.shrui %96, %97 : vector<8x128xi32>
    %99 = arith.xori %96, %98 : vector<8x128xi32>
    %c-2048144789_i32 = arith.constant -2048144789 : i32
    %100 = vector.broadcast %c-2048144789_i32 : i32 to vector<8x128xi32>
    %101 = arith.muli %99, %100 : vector<8x128xi32>
    %c13_i32 = arith.constant 13 : i32
    %102 = vector.broadcast %c13_i32 : i32 to vector<8x128xi32>
    %103 = arith.shrui %101, %102 : vector<8x128xi32>
    %104 = arith.xori %101, %103 : vector<8x128xi32>
    %c-1028477387_i32 = arith.constant -1028477387 : i32
    %105 = vector.broadcast %c-1028477387_i32 : i32 to vector<8x128xi32>
    %106 = arith.muli %104, %105 : vector<8x128xi32>
    %c16_i32 = arith.constant 16 : i32
    %107 = vector.broadcast %c16_i32 : i32 to vector<8x128xi32>
    %108 = arith.shrui %106, %107 : vector<8x128xi32>
    %109 = arith.xori %106, %108 : vector<8x128xi32>
    %c-2147483648_i32 = arith.constant -2147483648 : i32
    %110 = vector.broadcast %c-2147483648_i32 : i32 to vector<8x128xi32>
    %111 = arith.cmpi ult, %109, %110 : vector<8x128xi32>
    %cst_46 = arith.constant 2.000000e+00 : f32
    %112 = vector.broadcast %cst_46 : f32 to vector<8x128xf32>
    %113 = arith.mulf %33, %112 : vector<8x128xf32>
    %cst_47 = arith.constant 0.000000e+00 : f32
    %114 = vector.broadcast %cst_47 : f32 to vector<8x128xf32>
    %115 = arith.select %111, %113, %114 : vector<8x128xi1>, vector<8x128xf32>
    %c1024_i32 = arith.constant 1024 : i32
    %116 = vector.broadcast %c1024_i32 : i32 to vector<8x128xi32>
    %117 = arith.addi %90, %116 : vector<8x128xi32>
    %118 = vector.broadcast %85 : i32 to vector<8x128xi32>
    %119 = arith.xori %117, %118 : vector<8x128xi32>
    %c-1640531535_i32_48 = arith.constant -1640531535 : i32
    %120 = vector.broadcast %c-1640531535_i32_48 : i32 to vector<8x128xi32>
    %121 = arith.muli %119, %120 : vector<8x128xi32>
    %c15_i32_49 = arith.constant 15 : i32
    %122 = vector.broadcast %c15_i32_49 : i32 to vector<8x128xi32>
    %123 = arith.shrui %121, %122 : vector<8x128xi32>
    %124 = arith.xori %121, %123 : vector<8x128xi32>
    %c-2048144789_i32_50 = arith.constant -2048144789 : i32
    %125 = vector.broadcast %c-2048144789_i32_50 : i32 to vector<8x128xi32>
    %126 = arith.muli %124, %125 : vector<8x128xi32>
    %c13_i32_51 = arith.constant 13 : i32
    %127 = vector.broadcast %c13_i32_51 : i32 to vector<8x128xi32>
    %128 = arith.shrui %126, %127 : vector<8x128xi32>
    %129 = arith.xori %126, %128 : vector<8x128xi32>
    %c-1028477387_i32_52 = arith.constant -1028477387 : i32
    %130 = vector.broadcast %c-1028477387_i32_52 : i32 to vector<8x128xi32>
    %131 = arith.muli %129, %130 : vector<8x128xi32>
    %c16_i32_53 = arith.constant 16 : i32
    %132 = vector.broadcast %c16_i32_53 : i32 to vector<8x128xi32>
    %133 = arith.shrui %131, %132 : vector<8x128xi32>
    %134 = arith.xori %131, %133 : vector<8x128xi32>
    %c-2147483648_i32_54 = arith.constant -2147483648 : i32
    %135 = vector.broadcast %c-2147483648_i32_54 : i32 to vector<8x128xi32>
    %136 = arith.cmpi ult, %134, %135 : vector<8x128xi32>
    %cst_55 = arith.constant 2.000000e+00 : f32
    %137 = vector.broadcast %cst_55 : f32 to vector<8x128xf32>
    %138 = arith.mulf %57, %137 : vector<8x128xf32>
    %cst_56 = arith.constant 0.000000e+00 : f32
    %139 = vector.broadcast %cst_56 : f32 to vector<8x128xf32>
    %140 = arith.select %136, %138, %139 : vector<8x128xi1>, vector<8x128xf32>
    %c2048_i32 = arith.constant 2048 : i32
    %141 = vector.broadcast %c2048_i32 : i32 to vector<8x128xi32>
    %142 = arith.addi %90, %141 : vector<8x128xi32>
    %143 = vector.broadcast %85 : i32 to vector<8x128xi32>
    %144 = arith.xori %142, %143 : vector<8x128xi32>
    %c-1640531535_i32_57 = arith.constant -1640531535 : i32
    %145 = vector.broadcast %c-1640531535_i32_57 : i32 to vector<8x128xi32>
    %146 = arith.muli %144, %145 : vector<8x128xi32>
    %c15_i32_58 = arith.constant 15 : i32
    %147 = vector.broadcast %c15_i32_58 : i32 to vector<8x128xi32>
    %148 = arith.shrui %146, %147 : vector<8x128xi32>
    %149 = arith.xori %146, %148 : vector<8x128xi32>
    %c-2048144789_i32_59 = arith.constant -2048144789 : i32
    %150 = vector.broadcast %c-2048144789_i32_59 : i32 to vector<8x128xi32>
    %151 = arith.muli %149, %150 : vector<8x128xi32>
    %c13_i32_60 = arith.constant 13 : i32
    %152 = vector.broadcast %c13_i32_60 : i32 to vector<8x128xi32>
    %153 = arith.shrui %151, %152 : vector<8x128xi32>
    %154 = arith.xori %151, %153 : vector<8x128xi32>
    %c-1028477387_i32_61 = arith.constant -1028477387 : i32
    %155 = vector.broadcast %c-1028477387_i32_61 : i32 to vector<8x128xi32>
    %156 = arith.muli %154, %155 : vector<8x128xi32>
    %c16_i32_62 = arith.constant 16 : i32
    %157 = vector.broadcast %c16_i32_62 : i32 to vector<8x128xi32>
    %158 = arith.shrui %156, %157 : vector<8x128xi32>
    %159 = arith.xori %156, %158 : vector<8x128xi32>
    %c-2147483648_i32_63 = arith.constant -2147483648 : i32
    %160 = vector.broadcast %c-2147483648_i32_63 : i32 to vector<8x128xi32>
    %161 = arith.cmpi ult, %159, %160 : vector<8x128xi32>
    %cst_64 = arith.constant 2.000000e+00 : f32
    %162 = vector.broadcast %cst_64 : f32 to vector<8x128xf32>
    %163 = arith.mulf %81, %162 : vector<8x128xf32>
    %cst_65 = arith.constant 0.000000e+00 : f32
    %164 = vector.broadcast %cst_65 : f32 to vector<8x128xf32>
    %165 = arith.select %161, %163, %164 : vector<8x128xi1>, vector<8x128xf32>
    %c0_66 = arith.constant 0 : index
    %c0_67 = arith.constant 0 : index
    %166 = memref.load %arg5[%c0_66, %c0_67] : memref<3x2xf32, #tpu.memory_space<smem>>
    %167 = vector.broadcast %166 : f32 to vector<8x128xf32>
    %168 = arith.mulf %115, %167 : vector<8x128xf32>
    %c1_68 = arith.constant 1 : index
    %c0_69 = arith.constant 0 : index
    %169 = memref.load %arg5[%c1_68, %c0_69] : memref<3x2xf32, #tpu.memory_space<smem>>
    %170 = vector.broadcast %169 : f32 to vector<8x128xf32>
    %171 = arith.mulf %140, %170 : vector<8x128xf32>
    %172 = arith.addf %168, %171 : vector<8x128xf32>
    %c2_70 = arith.constant 2 : index
    %c0_71 = arith.constant 0 : index
    %173 = memref.load %arg5[%c2_70, %c0_71] : memref<3x2xf32, #tpu.memory_space<smem>>
    %174 = vector.broadcast %173 : f32 to vector<8x128xf32>
    %175 = arith.mulf %165, %174 : vector<8x128xf32>
    %176 = arith.addf %172, %175 : vector<8x128xf32>
    %c0_72 = arith.constant 0 : index
    %177 = memref.load %arg6[%c0_72] : memref<2xf32, #tpu.memory_space<smem>>
    %178 = vector.broadcast %177 : f32 to vector<8x128xf32>
    %179 = arith.addf %176, %178 : vector<8x128xf32>
    %c0_73 = arith.constant 0 : index
    %c1_74 = arith.constant 1 : index
    %180 = memref.load %arg5[%c0_73, %c1_74] : memref<3x2xf32, #tpu.memory_space<smem>>
    %181 = vector.broadcast %180 : f32 to vector<8x128xf32>
    %182 = arith.mulf %115, %181 : vector<8x128xf32>
    %c1_75 = arith.constant 1 : index
    %c1_76 = arith.constant 1 : index
    %183 = memref.load %arg5[%c1_75, %c1_76] : memref<3x2xf32, #tpu.memory_space<smem>>
    %184 = vector.broadcast %183 : f32 to vector<8x128xf32>
    %185 = arith.mulf %140, %184 : vector<8x128xf32>
    %186 = arith.addf %182, %185 : vector<8x128xf32>
    %c2_77 = arith.constant 2 : index
    %c1_78 = arith.constant 1 : index
    %187 = memref.load %arg5[%c2_77, %c1_78] : memref<3x2xf32, #tpu.memory_space<smem>>
    %188 = vector.broadcast %187 : f32 to vector<8x128xf32>
    %189 = arith.mulf %165, %188 : vector<8x128xf32>
    %190 = arith.addf %186, %189 : vector<8x128xf32>
    %c1_79 = arith.constant 1 : index
    %191 = memref.load %arg6[%c1_79] : memref<2xf32, #tpu.memory_space<smem>>
    %192 = vector.broadcast %191 : f32 to vector<8x128xf32>
    %193 = arith.addf %190, %192 : vector<8x128xf32>
    %194 = arith.maximumf %179, %193 : vector<8x128xf32>
    %195 = arith.subf %179, %194 : vector<8x128xf32>
    %196 = math.exp %195 : vector<8x128xf32>
    %197 = arith.subf %193, %194 : vector<8x128xf32>
    %198 = math.exp %197 : vector<8x128xf32>
    %199 = arith.addf %196, %198 : vector<8x128xf32>
    %cst_80 = arith.constant 1.000000e+00 : f32
    %200 = vector.broadcast %cst_80 : f32 to vector<8x128xf32>
    %201 = arith.divf %200, %199 : vector<8x128xf32>
    %202 = arith.mulf %196, %201 : vector<8x128xf32>
    %c0_81 = arith.constant 0 : index
    %c0_82 = arith.constant 0 : index
    %c0_83 = arith.constant 0 : index
    %203 = vector.load %arg7[%c0_81, %c0_82, %c0_83] : memref<2x8x128xf32, #tpu.memory_space<vmem>>, vector<1x8x128xf32>
    %204 = vector.shape_cast %203 : vector<1x8x128xf32> to vector<8x128xf32>
    %205 = vector.shape_cast %202 : vector<8x128xf32> to vector<1x8x128xf32>
    tpu.vector_store %arg7[%c0_81, %c0_82, %c0_83], %205 {strides = array<i32>} : memref<2x8x128xf32, #tpu.memory_space<vmem>>, vector<1x8x128xf32>,
    %206 = arith.mulf %198, %201 : vector<8x128xf32>
    %c1_84 = arith.constant 1 : index
    %c0_85 = arith.constant 0 : index
    %c0_86 = arith.constant 0 : index
    %207 = vector.load %arg7[%c1_84, %c0_85, %c0_86] : memref<2x8x128xf32, #tpu.memory_space<vmem>>, vector<1x8x128xf32>
    %208 = vector.shape_cast %207 : vector<1x8x128xf32> to vector<8x128xf32>
    %209 = vector.shape_cast %206 : vector<8x128xf32> to vector<1x8x128xf32>
    tpu.vector_store %arg7[%c1_84, %c0_85, %c0_86], %209 {strides = array<i32>} : memref<2x8x128xf32, #tpu.memory_space<vmem>>, vector<1x8x128xf32>,
    return
  }
  func.func @transform_0(%arg0: i32) -> i32 {
    %c0_i32 = arith.constant 0 : i32
    %c0_i32_0 = arith.constant 0 : i32
    return %c0_i32 : i32
  }
  func.func @transform_1(%arg0: i32) -> (i32, i32, i32) {
    %c0_i32 = arith.constant 0 : i32
    %c0_i32_0 = arith.constant 0 : i32
    %c0_i32_1 = arith.constant 0 : i32
    return %c0_i32, %arg0, %c0_i32_0 : i32, i32, i32
  }
  func.func @transform_2(%arg0: i32) -> (i32, i32) {
    %c0_i32 = arith.constant 0 : i32
    %c0_i32_0 = arith.constant 0 : i32
    %c0_i32_1 = arith.constant 0 : i32
    return %c0_i32, %c0_i32_0 : i32, i32
  }
  func.func @transform_3(%arg0: i32) -> i32 {
    %c0_i32 = arith.constant 0 : i32
    %c0_i32_0 = arith.constant 0 : i32
    return %c0_i32 : i32
  }
  func.func @transform_4(%arg0: i32) -> (i32, i32) {
    %c0_i32 = arith.constant 0 : i32
    %c0_i32_0 = arith.constant 0 : i32
    %c0_i32_1 = arith.constant 0 : i32
    return %c0_i32, %c0_i32_0 : i32, i32
  }
  func.func @transform_5(%arg0: i32) -> i32 {
    %c0_i32 = arith.constant 0 : i32
    %c0_i32_0 = arith.constant 0 : i32
    return %c0_i32 : i32
  }
  func.func @transform_6(%arg0: i32) -> (i32, i32, i32) {
    %c0_i32 = arith.constant 0 : i32
    %c0_i32_0 = arith.constant 0 : i32
    %c0_i32_1 = arith.constant 0 : i32
    return %c0_i32, %arg0, %c0_i32_0 : i32, i32, i32
  }
}

</mosaic_0001>

<bundles_post_ra>
// kernel: tpu_custom_call.1
= control target key start
LH: loop header
LB: loop body
LE: loop exit
PB: predicated region body
PF: predicated region fallthrough
CT: control target
= control target key end

     0   :  { %12 = vsyncpa [#allocation4], 0  ;;  %s554_s0 = inlined_call_operand.<no memory space> [shape: s32[1], index: 0, kind: input, shape index: {}]   ;;  %s555_s1 = inlined_call_operand.hbm [shape: f32[5,8,128], index: 1, kind: input, shape index: {}]   ;;  %s556_s2 = inlined_call_operand.vmem [shape: f32[5,3], index: 2, kind: input, shape index: {}]   ;;  %s557_s3 = inlined_call_operand.vmem [shape: f32[3], index: 3, kind: input, shape index: {}]   ;;  %s558_s4 = inlined_call_operand.vmem [shape: f32[3,2], index: 4, kind: input, shape index: {}]   ;;  %s559_s5 = inlined_call_operand.vmem [shape: f32[2], index: 5, kind: input, shape index: {}]   ;;  %s560_s6 = inlined_call_operand.hbm [shape: f32[2,8,128], index: 6, kind: output, shape index: {}]  }
   0x1   :  { %13 = vsyncpa [#allocation6], 0 }
   0x2   :  { %14 = vsyncpa [#allocation9], 0 }
   0x3   :  { %15 = vsyncpa [#allocation12], 0  ;;  %s47_s23 = sshll.u32 %s557_s3, 4  ;;  %s48_s23 = int_to_ptr.vmem [resolvable:$true] %s47_s23 }
   0x4   :  { %16 = vsyncpa [#allocation5], 0  ;;  %s316_s24 = scalar_lea.vmem %s48_s23, 16  ;;  %p321_p1 = scmp.lt.s32.totalorder %s48_s23, %s48_s23 }
   0x5   :  { %p317_p0 = scmp.ne.s32.totalorder %s48_s23, %s316_s24  ;;  %p322_p2 = scmp.lt.s32.totalorder %s316_s24, %s316_s24 }
   0x7   :  { %p323_p3 = por %p322_p2, %p321_p1 }
   0x9   :  { %p324_p4 = pnand %p323_p3, %p317_p0 }
   0xb   :  { %327 = shalt.err (!%p324_p4)
}
   0xc   :  { %s418_s25 = smov [#allocation8]   ;;  %s419_s26 = smov [#allocation3]  }
   0xd   :  { %50 = dma.vmem_to_smem %s48_s23, 16, %s418_s25, [#allocation9]  }
   0xe   :  { %s24_s27 = sshll.u32 %s419_s26, 4  ;;  %s328_s30 = scalar_lea.hbm %s555_s1, 640  ;;  %s25_s27 = int_to_ptr.vmem [resolvable:$true] %s24_s27 }
   0xf   :  { %p329_p5 = scmp.ne.s32.totalorder %s555_s1, %s328_s30  ;;  %p332_p6 = scmp.lt.u32.totalorder %s328_s30, %s555_s1 }
  0x11   :  { %p334_p7 = pnand %p332_p6, %p329_p5 }
  0x13   :  { %337 = shalt.err (!%p334_p7)
}
  0x14   :  { %s338_s10 = scalar_lea.vmem %s25_s27, 640  ;;  %p343_p9 = scmp.lt.s32.totalorder %s25_s27, %s25_s27 }
  0x15   :  { %p339_p8 = scmp.ne.s32.totalorder %s25_s27, %s338_s10  ;;  %p344_p10 = scmp.lt.s32.totalorder %s338_s10, %s338_s10 }
  0x17   :  { %p345_p11 = por %p344_p10, %p343_p9 }
  0x19   :  { %p346_p12 = pnand %p345_p11, %p339_p8 }
  0x1b   :  { %349 = shalt.err (!%p346_p12)
}
  0x1c   :  { %s420_s11 = smov 128   ;;  %s421_s12 = smov 8  }
  0x1d   :  { %30 = dma.hbm_to_vmem [thread:$0]  %s555_s1, 640, %s25_s27, [#allocation4], %s420_s11, %s420_s11, %s421_s12  }
  0x1e   :  { %s37_s17 = sshll.u32 %s556_s2, 4  ;;  %s57_s20 = sshll.u32 %s558_s4, 4  ;;  %s38_s17 = int_to_ptr.vmem [resolvable:$true] %s37_s17  ;;  %s58_s20 = int_to_ptr.vmem [resolvable:$true] %s57_s20 }
  0x1f   :  { %s350_s21 = scalar_lea.vmem %s38_s17, 128  ;;  %p355_p0 = scmp.lt.s32.totalorder %s38_s17, %s38_s17 }
  0x20   :  { %p351_p13 = scmp.ne.s32.totalorder %s38_s17, %s350_s21  ;;  %p356_p1 = scmp.lt.s32.totalorder %s350_s21, %s350_s21 }
  0x22   :  { %p357_p2 = por %p356_p1, %p355_p0 }
  0x24   :  { %p358_p3 = pnand %p357_p2, %p351_p13 }
  0x26   :  { %361 = shalt.err (!%p358_p3)
}
  0x27   :  { %s422_s22 = smov [#allocation7]   ;;  %s362_s1 = scalar_lea.vmem %s58_s20, 64 }
  0x28   :  { %40 = dma.vmem_to_smem %s38_s17, 128, %s422_s22, [#allocation6]  }
  0x29   :  { %p363_p4 = scmp.ne.s32.totalorder %s58_s20, %s362_s1  ;;  %p367_p5 = scmp.lt.s32.totalorder %s58_s20, %s58_s20 }
  0x2a   :  { %p368_p6 = scmp.lt.s32.totalorder %s362_s1, %s362_s1 }
  0x2c   :  { %p369_p7 = por %p368_p6, %p367_p5 }
  0x2e   :  { %p370_p8 = pnand %p369_p7, %p363_p4 }
  0x30   :  { %373 = shalt.err (!%p370_p8)
}
  0x31   :  { %s423_s2 = smov [#allocation10]   ;;  %s67_s24 = sshll.u32 %s559_s5, 4  ;;  %s68_s24 = int_to_ptr.vmem [resolvable:$true] %s67_s24 }
  0x32   :  { %60 = dma.vmem_to_smem %s58_s20, 64, %s423_s2, [#allocation9]  }
  0x33   :  { %s374_s25 = scalar_lea.vmem %s68_s24, 16  ;;  %p379_p10 = scmp.lt.s32.totalorder %s68_s24, %s68_s24 }
  0x34   :  { %p375_p9 = scmp.ne.s32.totalorder %s68_s24, %s374_s25  ;;  %p380_p11 = scmp.lt.s32.totalorder %s374_s25, %s374_s25 }
  0x36   :  { %p381_p12 = por %p380_p11, %p379_p10 }
  0x38   :  { %p382_p13 = pnand %p381_p12, %p375_p9 }
  0x3a   :  { %385 = shalt.err (!%p382_p13)
}
  0x3b   :  { %s424_s26 = smov [#allocation11]  }
  0x3c   :  { %70 = dma.vmem_to_smem %s68_s24, 16, %s424_s26, [#allocation12]  }
  0x3d   :  { %408 = dma.done.wait [#allocation4], 640  }
  0x3e   :  { %409 = vsyncadd [#allocation4], 4294966656 }
  0x3f   :  { %410 = dma.done.wait [#allocation6], 128  }
  0x40   :  { %411 = vsyncadd [#allocation6], 4294967168 }
  0x41   :  { %412 = dma.done.wait [#allocation9], 80  }
  0x42   :  { %413 = vsyncadd [#allocation9], 4294967216 }
  0x43   :  { %414 = dma.done.wait [#allocation12], 16  }
  0x44   :  { %415 = vsyncadd [#allocation12], 4294967280 }
  0x45   :  { %86 = sfence }
  0x46   :  { %s96_s5 = sld [smem:[#allocation7]]  ;;  %v169_v0 = vlaneseq  ;;  %s284_s30 = sld [smem:[#allocation7 + $0x1]]  ;;  %v87_v1 = vld [vmem:[#allocation3] sm:$0xff]  ;;  %v89_v3 = vld [vmem:[#allocation3 + $0x8] sm:$0xff]  ;;  %v91_v7 = vld [vmem:[#allocation3 + $0x10] sm:$0xff] }
  0x47   :  { %s280_s27 = sld [smem:[#allocation7 + $0x80]]  ;;  %s285_s7 = sld [smem:[#allocation7 + $0x81]]  ;;  %v93_v19 = vld [vmem:[#allocation3 + $0x18] sm:$0xff]  ;;  %v95_v32 = vld [vmem:[#allocation3 + $0x20] sm:$0xff] }
  0x48   :  { %s281_s28 = sld [smem:[#allocation7 + $0x100]]  ;;  %s286_s3 = sld [smem:[#allocation7 + $0x101]]  ;;  %v170_v2 = vshrl.u32 %v169_v0, 7  ;;  %v172_v10 = vand.u32 127, %v169_v0 }
  0x49   :  { %s488_s29 = sld [smem:[#allocation7 + $0x180]]  ;;  %s492_s9 = sld [smem:[#allocation7 + $0x181]] }
  0x4a   :  { %s490_s8 = sld [smem:[#allocation7 + $0x200]]  ;;  %s494_s10 = sld [smem:[#allocation7 + $0x201]]  ;;  %v173_v11 = vmul.u32 128, %v170_v2 }
  0x4b   :  { %s496_s13 = sld [smem:[#allocation7 + $0x2]]  ;;  %s168_s20 = smul.u32 668265263, %s554_s0 }
  0x4c   :  { %v97_v4 = vstv %s96_s5  ;;  %s291_s14 = sld [smem:[#allocation7 + $0x82]]  ;;  %v120_v12 = vstv %s284_s30  ;;  %v174_v23 = vadd.s32 %v173_v11, %v172_v10  ;;  %s511_s21 = sld [smem:[#allocation8]] }
  0x4d   :  { %v98_v5 = vmul.f32 %v97_v4, %v87_v1  ;;  %v100_v6 = vstv %s280_s27  ;;  %s292_s15 = sld [smem:[#allocation7 + $0x102]]  ;;  %v121_v13 = vmul.f32 %v120_v12, %v87_v1  ;;  %v123_v14 = vstv %s285_s7  ;;  %s513_s22 = sld [smem:[#allocation8 + $0x1]] }
  0x4e   :  { %v101_v8 = vmul.f32 %v100_v6, %v89_v3  ;;  %v104_v9 = vstv %s281_s28  ;;  %s498_s16 = sld [smem:[#allocation7 + $0x182]]  ;;  %v127_v15 = vstv %s286_s3  ;;  %v124_v18 = vmul.f32 %v123_v14, %v89_v3  ;;  %s521_s1 = sld [smem:[#allocation10]] }
  0x4f   :  { %s500_s17 = sld [smem:[#allocation7 + $0x202]]  ;;  %v105_v17 = vmul.f32 %v104_v9, %v91_v7  ;;  %v108_v20 = vstv %s488_s29  ;;  %v128_v21 = vmul.f32 %v127_v15, %v91_v7  ;;  %v131_v22 = vstv %s492_s9  ;;  %s523_s2 = sld [smem:[#allocation10 + $0x80]] }
  0x50   :  { %v102_v16 = vadd.f32 %v101_v8, %v98_v5  ;;  %v125_v24 = vadd.f32 %v124_v18, %v121_v13  ;;  %v112_v28 = vstv %s490_s8  ;;  %v109_v34 = vmul.f32 %v108_v20, %v93_v19  ;;  %s516_s0 = sld [smem:[#allocation8 + $0x2]]  ;;  %s525_s4 = sld [smem:[#allocation10 + $0x100]] }
  0x51   :  { %v143_v25 = vstv %s496_s13  ;;  %v135_v35 = vstv %s494_s10  ;;  %v132_v38 = vmul.f32 %v131_v22, %v93_v19  ;;  %v175_v42 = vstv %s168_s20  ;;  %s527_s23 = sld [smem:[#allocation10 + $0x1]]  ;;  %s228_s26 = sld [smem:[#allocation11]] }
  0x52   :  { %v146_v26 = vstv %s291_s14  ;;  %v144_v29 = vmul.f32 %v143_v25, %v87_v1  ;;  %v106_v33 = vadd.f32 %v105_v17, %v102_v16  ;;  %v129_v37 = vadd.f32 %v128_v21, %v125_v24  ;;  %s529_s24 = sld [smem:[#allocation10 + $0x81]]  ;;  %s425_s27 = smov [#allocation13]  }
  0x53   :  { %v150_v27 = vstv %s292_s15  ;;  %v147_v30 = vmul.f32 %v146_v26, %v89_v3  ;;  %v189_v43 = vadd.s32 1024, %v174_v23  ;;  %v203_v44 = vadd.s32 2048, %v174_v23  ;;  %s531_s25 = sld [smem:[#allocation10 + $0x101]]  ;;  %s265_s28 = sshll.u32 %s425_s27, 4  ;;  %s266_s28 = int_to_ptr.vmem [resolvable:$true] %s265_s28 }
  0x54   :  { %v151_v31 = vmul.f32 %v150_v27, %v91_v7  ;;  %v154_v36 = vstv %s498_s16  ;;  %v113_v45 = vmul.f32 %v112_v28, %v95_v32  ;;  %v176_v47 = vxor.u32 %v175_v42, %v174_v23  ;;  %s301_s5 = sld [smem:[#allocation11 + $0x1]]  ;;  %s386_s29 = scalar_lea.vmem %s266_s28, 256 }
  0x55   :  { %v148_v39 = vadd.f32 %v147_v30, %v144_v29  ;;  %v155_v40 = vmul.f32 %v154_v36, %v93_v19  ;;  %v158_v41 = vstv %s500_s17  ;;  %v110_v48 = vadd.f32 %v109_v34, %v106_v33  ;;  %p387_p0 = scmp.ne.s32.totalorder %s266_s28, %s386_s29  ;;  %p391_p1 = scmp.lt.s32.totalorder %s266_s28, %s266_s28 }
  0x56   :  { %v136_v49 = vmul.f32 %v135_v35, %v95_v32  ;;  %v190_v50 = vxor.u32 %v189_v43, %v175_v42  ;;  %v204_v51 = vxor.u32 %v203_v44, %v175_v42  ;;  %v133_v52 = vadd.f32 %v132_v38, %v129_v37  ;;  %p392_p2 = scmp.lt.s32.totalorder %s386_s29, %s386_s29 }
  0x57   :  { %v152_v46 = vadd.f32 %v151_v31, %v148_v39  ;;  %v159_v54 = vmul.f32 %v158_v41, %v95_v32  ;;  %v177_v55 = vmul.u32 2654435761, %v176_v47  ;;  %v114_v59 = vadd.f32 %v113_v45, %v110_v48 }
  0x58   :  { %v191_v56 = vmul.u32 2654435761, %v190_v50  ;;  %v205_v57 = vmul.u32 2654435761, %v204_v51  ;;  %v116_v62 = vstv %s511_s21  ;;  %v137_v63 = vadd.f32 %v136_v49, %v133_v52  ;;  %p393_p3 = por %p392_p2, %p391_p1 }
  0x59   :  { %v156_v53 = vadd.f32 %v155_v40, %v152_v46  ;;  %v178_v58 = vshrl.u32 %v177_v55, 15  ;;  %v139_v2 = vstv %s513_s22  ;;  %v162_v3 = vstv %s516_s0 }
  0x5a   :  { %v192_v60 = vshrl.u32 %v191_v56, 15  ;;  %v206_v61 = vshrl.u32 %v205_v57, 15  ;;  %v117_v7 = vadd.f32 %v116_v62, %v114_v59  ;;  %v140_v10 = vadd.f32 %v139_v2, %v137_v63  ;;  %p394_p4 = pnand %p393_p3, %p387_p0 }
  0x5b   :  { %v160_v0 = vadd.f32 %v159_v54, %v156_v53  ;;  %v179_v1 = vxor.u32 %v178_v58, %v177_v55  ;;  %v218_v31 = vstv %s521_s1  ;;  %v221_v34 = vstv %s523_s2 }
  0x5c   :  { %v193_v4 = vxor.u32 %v192_v60, %v191_v56  ;;  %v207_v5 = vxor.u32 %v206_v61, %v205_v57  ;;  %v118_v16 = vmax.f32 %v117_v7, 0.0  ;;  %v141_v19 = vmax.f32 %v140_v10, 0.0 }
  0x5d   :  { %v180_v6 = vmul.u32 2246822507, %v179_v1  ;;  %v163_v11 = vadd.f32 %v162_v3, %v160_v0  ;;  %v232_v35 = vstv %s527_s23  ;;  %v225_v36 = vstv %s525_s4 }
  0x5e   :  { %v194_v8 = vmul.u32 2246822507, %v193_v4  ;;  %v208_v9 = vmul.u32 2246822507, %v207_v5  ;;  %v187_v25 = vmul.f32 2.0, %v118_v16  ;;  %v201_v29 = vmul.f32 2.0, %v141_v19 }
  0x5f   :  { %v181_v12 = vshrl.u32 %v180_v6, 13  ;;  %v164_v20 = vmax.f32 %v163_v11, 0.0  ;;  %v235_v37 = vstv %s529_s24  ;;  %v239_v38 = vstv %s531_s25 }
  0x60   :  { %v195_v13 = vshrl.u32 %v194_v8, 13  ;;  %v209_v14 = vshrl.u32 %v208_v9, 13  ;;  %v229_v50 = vstv %s228_s26  ;;  %v243_v51 = vstv %s301_s5 }
  0x61   :  { %v182_v15 = vxor.u32 %v181_v12, %v180_v6  ;;  %v215_v30 = vmul.f32 2.0, %v164_v20 }
  0x62   :  { %v196_v17 = vxor.u32 %v195_v13, %v194_v8  ;;  %v210_v18 = vxor.u32 %v209_v14, %v208_v9 }
  0x63   :  { %v183_v21 = vmul.u32 3266489909, %v182_v15 }
  0x64   :  { %v197_v22 = vmul.u32 3266489909, %v196_v17  ;;  %v211_v23 = vmul.u32 3266489909, %v210_v18 }
  0x65   :  { %v184_v24 = vshrl.u32 %v183_v21, 16 }
  0x66   :  { %v198_v26 = vshrl.u32 %v197_v22, 16  ;;  %v212_v27 = vshrl.u32 %v211_v23, 16 }
  0x67   :  { %v185_v28 = vxor.u32 %v184_v24, %v183_v21 }
  0x68   :  { %v199_v32 = vxor.u32 %v198_v26, %v197_v22  ;;  %v213_v33 = vxor.u32 %v212_v27, %v211_v23 }
  0x69   :  { %vm186_vm0 = vcmp.lt.u32.totalorder %v185_v28, 2147483648 }
  0x6a   :  { %v188_v39 = vsel %vm186_vm0, %v187_v25, 0.0  ;;  %vm200_vm1 = vcmp.lt.u32.totalorder %v199_v32, 2147483648  ;;  %vm214_vm2 = vcmp.lt.u32.totalorder %v213_v33, 2147483648 }
  0x6b   :  { %v202_v40 = vsel %vm200_vm1, %v201_v29, 0.0  ;;  %v216_v41 = vsel %vm214_vm2, %v215_v30, 0.0  ;;  %v219_v42 = vmul.f32 %v218_v31, %v188_v39  ;;  %v233_v43 = vmul.f32 %v232_v35, %v188_v39 }
  0x6c   :  { %v222_v44 = vmul.f32 %v221_v34, %v202_v40  ;;  %v226_v45 = vmul.f32 %v225_v36, %v216_v41  ;;  %v236_v46 = vmul.f32 %v235_v37, %v202_v40  ;;  %v240_v47 = vmul.f32 %v239_v38, %v216_v41 }
  0x6e   :  { %v223_v48 = vadd.f32 %v222_v44, %v219_v42  ;;  %v237_v49 = vadd.f32 %v236_v46, %v233_v43 }
  0x70   :  { %v227_v52 = vadd.f32 %v226_v45, %v223_v48  ;;  %v241_v53 = vadd.f32 %v240_v47, %v237_v49 }
  0x72   :  { %v230_v54 = vadd.f32 %v229_v50, %v227_v52  ;;  %v244_v55 = vadd.f32 %v243_v51, %v241_v53 }
  0x74   :  { %v245_v56 = vmax.f32 %v230_v54, %v244_v55 }
  0x76   :  { %v246_v57 = vsub.f32 %v230_v54, %v245_v56  ;;  %v249_v58 = vsub.f32 %v244_v55, %v245_v56 }
  0x78   :  { %v247_v59 = vmul.f32 1.442695, %v246_v57  ;;  %v250_v60 = vmul.f32 1.442695, %v249_v58 }
  0x7a   :  { %310 = vpow2.f32 %v247_v59 }
  0x7b   :  { %312 = vpow2.f32 %v250_v60 }
  0x84   :  { %v311_v61 = vpop.eup %310 }
  0x85   :  { %v313_v62 = vpop.eup %312 }
  0x86   :  { %v252_v63 = vadd.f32 %v313_v62, %v311_v61 }
  0x88   :  { %314 = vrcp.f32 %v252_v63 }
  0x92   :  { %v315_v0 = vpop.eup %314 }
  0x93   :  { %v255_v1 = vmul.f32 %v315_v0, %v311_v61  ;;  %v257_v2 = vmul.f32 %v315_v0, %v313_v62 }
  0x95   :  { %256 = vst [vmem:[#allocation13] sm:$0xff] %v255_v1  ;;  %259 = vst [vmem:[#allocation13 + $0x8] sm:$0xff] %v257_v2 }
  0x96   :  { %397 = shalt.err (!%p394_p4)
}
  0x97   :  { %s398_s3 = scalar_lea.hbm %s560_s6, 256 }
  0x98   :  { %p399_p5 = scmp.ne.s32.totalorder %s560_s6, %s398_s3  ;;  %p402_p6 = scmp.lt.u32.totalorder %s398_s3, %s560_s6 }
  0x9a   :  { %p404_p7 = pnand %p402_p6, %p399_p5 }
  0x9c   :  { %407 = shalt.err (!%p404_p7)
}
  0x9d   :  { %271 = dma.vmem_to_hbm [thread:$0]  %s266_s28, 256, %s560_s6, [#allocation5], %s420_s11, %s420_s11, %s421_s12  }
  0x9e   :  { %416 = dma.done.wait [#allocation5], 256  }
  0x9f   :  { %417 = vsyncadd [#allocation5], 4294967040 }
  0xa0   :  { %275 = vsyncpa [#allocation4], 1 }
  0xa1   :  { %276 = vsyncpa [#allocation5], 1 }
  0xa2   :  { %277 = vsyncpa [#allocation6], 1 }
  0xa3   :  { %278 = vsyncpa [#allocation9], 1 }
  0xa4   :  { %279 = vsyncpa [#allocation12], 1 }

</bundles_post_ra>
